<compile_context>
chip_gen: v6e
topology: v6e:2x2x1
jax: 0.10.0
libtpu: 0.0.40
codegen_flags: <defaults>
</compile_context>

<pallas_src>
import functools

import jax
import jax.numpy as jnp
from jax import lax
from jax.experimental import pallas as pl
from jax.experimental.pallas import tpu as pltpu

EMBED_DIM = 50   # embedding_dim
HIDDEN = 16      # hidden_dim


def lstm_bidir_kernel(T, B, emb_ref, wih_ref, whh_ref, b_ref,
                      wcls_ref, bcls_ref, out_ref):
    """Fused bidirectional LSTM + classifier.

    emb_ref : (T*B, 2E)  row block t holds [x_t | x_{T-1-t}] per batch row
    wih_ref : (2E, 8H)   block-diagonal input weights, gate cols interleaved
    whh_ref : (2H, 8H)   block-diagonal recurrent weights
    b_ref   : (1, 8H)    fused biases (b_ih + b_hh, both directions)
    wcls_ref: (2H, 1), bcls_ref: (1, 1)
    out_ref : (B, 1)
    """
    H = HIDDEN

    # One lane-dense input projection for both directions and all timesteps;
    # biases folded in here (nothing is re-broadcast inside the loop).
    g_all = (jnp.dot(emb_ref[...], wih_ref[...],
                     preferred_element_type=jnp.float32) + b_ref[...])   # (T*B, 8H)

    whh = whh_ref[...]                        # hoisted out of the loop
    h = jnp.zeros((B, 2 * H), jnp.float32)    # [h_fwd | h_bwd]
    c = jnp.zeros((B, 2 * H), jnp.float32)    # [c_fwd | c_bwd]

    # Fused fwd/bwd recurrence, fully unrolled (T static & small): the only
    # sequential work per step is h @ Whh + elementwise gate math.
    for t in range(T):
        gates = g_all[t * B:(t + 1) * B, :] + jnp.dot(
            h, whh, preferred_element_type=jnp.float32)                 # (B, 8H)
        # gate column layout: [i_f,i_b,f_f,f_b,o_f,o_b,g_f,g_b], each H wide
        sg = jax.nn.sigmoid(gates[:, :6 * H])                           # (B, 6H)
        g = jnp.tanh(gates[:, 6 * H:])                                  # (B, 2H)
        i = sg[:, 0 * 2 * H:1 * 2 * H]
        f = sg[:, 1 * 2 * H:2 * 2 * H]
        o = sg[:, 2 * 2 * H:3 * 2 * H]
        c = f * c + i * g
        h = o * jnp.tanh(c)

    # h == concat([h_fwd_final, h_bwd_final], -1)
    #   == PyTorch hidden.transpose(0,1).reshape(B, -1)
    out_ref[...] = (jnp.dot(h, wcls_ref[...],
                            preferred_element_type=jnp.float32) + bcls_ref[...])


# ----------------------------------------------------------------------------
# Parameter setup (PyTorch layout: gate order [i, f, g, o]) and kernel-facing
# fused/reordered parameter construction.
# ----------------------------------------------------------------------------

def init_params(key, vocab_len, padding_idx):
    E, H = EMBED_DIM, HIDDEN
    ks = jax.random.split(key, 12)
    scale = 1.0 / jnp.sqrt(H)

    emb = jax.random.normal(ks[0], (vocab_len, E), jnp.float32)
    emb = emb.at[padding_idx].set(0.0)                    # padding_idx row is zero

    def u(k, shape):
        return jax.random.uniform(k, shape, jnp.float32, -scale, scale)

    params = {
        "embedding": emb,
        # weights stored transposed (in_features, 4H) so x @ W; gate order [i,f,g,o]
        "wih_f": u(ks[1], (E, 4 * H)),
        "whh_f": u(ks[2], (H, 4 * H)),
        "b_f":   u(ks[3], (1, 4 * H)) + u(ks[4], (1, 4 * H)),   # b_ih + b_hh
        "wih_b": u(ks[5], (E, 4 * H)),
        "whh_b": u(ks[6], (H, 4 * H)),
        "b_b":   u(ks[7], (1, 4 * H)) + u(ks[8], (1, 4 * H)),
        "wcls":  u(ks[9], (2 * H, 1)),
        "bcls":  u(ks[10], (1, 1)),
    }
    return params


def _reorder_ifog(w):
    """PyTorch LSTM gate column order [i, f, g, o] -> [i, f, o, g]."""
    H = HIDDEN
    return jnp.concatenate([w[..., :2 * H], w[..., 3 * H:4 * H],
                            w[..., 2 * H:3 * H]], axis=-1)


def _fuse_gate_matrix(wf, wb):
    """Block-diagonal fusion of fwd/bwd weights (cols [i,f,o,g] each) into the
    column layout [i_f,i_b,f_f,f_b,o_f,o_b,g_f,g_b]; fwd rows feed only the
    *_f columns, bwd rows only the *_b columns."""
    H = HIDDEN
    rf, rb = wf.shape[0], wb.shape[0]
    out = jnp.zeros((rf + rb, 8 * H), jnp.float32)
    for gi in range(4):
        out = out.at[:rf, (2 * gi) * H:(2 * gi + 1) * H].set(
            wf[:, gi * H:(gi + 1) * H])
        out = out.at[rf:, (2 * gi + 1) * H:(2 * gi + 2) * H].set(
            wb[:, gi * H:(gi + 1) * H])
    return out


def _fuse_bias(bf, bb):
    H = HIDDEN
    parts = []
    for gi in range(4):
        parts.append(bf[:, gi * H:(gi + 1) * H])
        parts.append(bb[:, gi * H:(gi + 1) * H])
    return jnp.concatenate(parts, axis=-1)


@jax.jit
def model_forward(tokens, params):
    B, T = tokens.shape
    E, H = EMBED_DIM, HIDDEN

    # Gather embeddings time-major directly and pair each timestep t with the
    # backward direction's input x_{T-1-t} on the lane axis.
    emb_tm = params["embedding"][tokens.T].astype(jnp.float32)      # (T, B, E)
    emb_pair = jnp.concatenate([emb_tm, emb_tm[::-1]], axis=-1)     # (T, B, 2E)

    # Pad the batch to a full 8-row f32 sublane tile (free throughput).
    b_pad = max(8, -(-B // 8) * 8)
    if b_pad != B:
        emb_pair = jnp.pad(emb_pair, ((0, 0), (0, b_pad - B), (0, 0)))
    emb_flat = emb_pair.reshape(T * b_pad, 2 * E)                   # (T*B, 2E)

    # Fuse / reorder the LSTM parameters into the kernel's gate layout.
    wih_blk = _fuse_gate_matrix(_reorder_ifog(params["wih_f"]),
                                _reorder_ifog(params["wih_b"]))     # (2E, 8H)
    whh_blk = _fuse_gate_matrix(_reorder_ifog(params["whh_f"]),
                                _reorder_ifog(params["whh_b"]))     # (2H, 8H)
    b_all = _fuse_bias(_reorder_ifog(params["b_f"]),
                       _reorder_ifog(params["b_b"]))                # (1, 8H)

    vmem = pl.BlockSpec(memory_space=pltpu.MemorySpace.VMEM)
    out = pl.pallas_call(
        functools.partial(lstm_bidir_kernel, T, b_pad),
        out_shape=jax.ShapeDtypeStruct((b_pad, 1), jnp.float32),
        in_specs=[vmem] * 6,
        out_specs=vmem,
    )(emb_flat, wih_blk, whh_blk, b_all, params["wcls"], params["bcls"])
    return out[:B, 0]                                               # logits (B,)


# ----------------------------------------------------------------------------
# Pure-JAX reference matching PyTorch bidirectional-LSTM semantics.
# ----------------------------------------------------------------------------

def reference_forward(tokens, params):
    H = HIDDEN
    emb = params["embedding"][tokens]                               # (B, T, E)

    def run_dir(xs, wih, whh, b):
        def step(carry, x):
            h, c = carry
            gates = x @ wih + h @ whh + b
            i = jax.nn.sigmoid(gates[:, 0 * H:1 * H])
            f = jax.nn.sigmoid(gates[:, 1 * H:2 * H])
            g = jnp.tanh(gates[:, 2 * H:3 * H])
            o = jax.nn.sigmoid(gates[:, 3 * H:4 * H])
            c = f * c + i * g
            h = o * jnp.tanh(c)
            return (h, c), None

        B = xs.shape[1]
        h0 = jnp.zeros((B, H), jnp.float32)
        (h, _), _ = lax.scan(step, (h0, h0), xs)
        return h

    xs = jnp.transpose(emb, (1, 0, 2))                              # (T, B, E)
    h_f = run_dir(xs, params["wih_f"], params["whh_f"], params["b_f"])
    h_b = run_dir(xs[::-1], params["wih_b"], params["whh_b"], params["b_b"])
    h_cat = jnp.concatenate([h_f, h_b], axis=-1)
    return (h_cat @ params["wcls"] + params["bcls"]).reshape(-1)


if __name__ == "__main__":
    key = jax.random.PRNGKey(0)
    k_param, k_tok = jax.random.split(key)

    vocab_len = 32
    padding_idx = 0
    B, T = 4, 8

    params = init_params(k_param, vocab_len, padding_idx)
    tokens = jax.random.randint(k_tok, (B, T), 0, vocab_len, dtype=jnp.int32)

    logits = model_forward(tokens, params)
    jax.block_until_ready(logits)

    ref = reference_forward(tokens, params)
    assert logits.shape == (B,)
    assert jnp.allclose(logits, ref, atol=1e-4, rtol=1e-4), (logits, ref)

    print("KERNEL_OK")
</pallas_src>

<mosaic_0001>
module attributes {stable_mosaic.version = 11 : i64} {
  func.func @lstm_bidir_kernel(%arg0: memref<64x100xf32, #tpu.memory_space<vmem>>, %arg1: memref<100x128xf32, #tpu.memory_space<vmem>>, %arg2: memref<32x128xf32, #tpu.memory_space<vmem>>, %arg3: memref<1x128xf32, #tpu.memory_space<vmem>>, %arg4: memref<32x1xf32, #tpu.memory_space<vmem>>, %arg5: memref<1x1xf32, #tpu.memory_space<vmem>>, %arg6: memref<8x1xf32, #tpu.memory_space<vmem>>) attributes {dimension_semantics = [], scalar_prefetch = 0 : i64, scratch_operands = 0 : i64, tpu.core_type = #tpu.core_type<tc>} {
    %c0 = arith.constant 0 : index
    %c0_0 = arith.constant 0 : index
    %0 = vector.load %arg0[%c0, %c0_0] : memref<64x100xf32, #tpu.memory_space<vmem>>, vector<64x100xf32>
    %c0_1 = arith.constant 0 : index
    %c0_2 = arith.constant 0 : index
    %1 = vector.load %arg1[%c0_1, %c0_2] : memref<100x128xf32, #tpu.memory_space<vmem>>, vector<100x128xf32>
    %cst = arith.constant dense<0.000000e+00> : vector<64x128xf32>
    %2 = tpu.matmul %0, %1, %cst {dimension_numbers = #tpu.dot_dimension_numbers<[1], [0], [0], [1], [0, 0, 1, 1], [], []>} : vector<64x100xf32>, vector<100x128xf32>, vector<64x128xf32> -> vector<64x128xf32>
    %c0_3 = arith.constant 0 : index
    %c0_4 = arith.constant 0 : index
    %3 = vector.load %arg3[%c0_3, %c0_4] : memref<1x128xf32, #tpu.memory_space<vmem>>, vector<1x128xf32>
    %4 = vector.broadcast %3 : vector<1x128xf32> to vector<64x128xf32>
    %5 = arith.addf %2, %4 : vector<64x128xf32>
    %c0_5 = arith.constant 0 : index
    %c0_6 = arith.constant 0 : index
    %6 = vector.load %arg2[%c0_5, %c0_6] : memref<32x128xf32, #tpu.memory_space<vmem>>, vector<32x128xf32>
    %cst_7 = arith.constant 0.000000e+00 : f32
    %7 = vector.broadcast %cst_7 : f32 to vector<8x32xf32>
    %cst_8 = arith.constant 0.000000e+00 : f32
    %8 = vector.broadcast %cst_8 : f32 to vector<8x32xf32>
    %9 = vector.extract_strided_slice %5 {offsets = [0, 0], sizes = [8, 128], strides = [1, 1]} : vector<64x128xf32> to vector<8x128xf32>
    %cst_9 = arith.constant dense<0.000000e+00> : vector<8x128xf32>
    %10 = tpu.matmul %7, %6, %cst_9 {dimension_numbers = #tpu.dot_dimension_numbers<[1], [0], [0], [1], [0, 0, 1, 1], [], []>} : vector<8x32xf32>, vector<32x128xf32>, vector<8x128xf32> -> vector<8x128xf32>
    %11 = arith.addf %9, %10 : vector<8x128xf32>
    %12 = vector.extract_strided_slice %11 {offsets = [0, 0], sizes = [8, 96], strides = [1, 1]} : vector<8x128xf32> to vector<8x96xf32>
    %13 = arith.negf %12 : vector<8x96xf32>
    %14 = math.exp %13 : vector<8x96xf32>
    %cst_10 = arith.constant 1.000000e+00 : f32
    %15 = vector.broadcast %cst_10 : f32 to vector<8x96xf32>
    %16 = arith.addf %15, %14 : vector<8x96xf32>
    %17 = arith.divf %15, %16 : vector<8x96xf32>
    %18 = vector.extract_strided_slice %11 {offsets = [0, 96], sizes = [8, 32], strides = [1, 1]} : vector<8x128xf32> to vector<8x32xf32>
    %19 = math.tanh %18 : vector<8x32xf32>
    %20 = vector.extract_strided_slice %17 {offsets = [0, 0], sizes = [8, 32], strides = [1, 1]} : vector<8x96xf32> to vector<8x32xf32>
    %21 = vector.extract_strided_slice %17 {offsets = [0, 32], sizes = [8, 32], strides = [1, 1]} : vector<8x96xf32> to vector<8x32xf32>
    %22 = vector.extract_strided_slice %17 {offsets = [0, 64], sizes = [8, 32], strides = [1, 1]} : vector<8x96xf32> to vector<8x32xf32>
    %23 = arith.mulf %21, %8 : vector<8x32xf32>
    %24 = arith.mulf %20, %19 : vector<8x32xf32>
    %25 = arith.addf %23, %24 : vector<8x32xf32>
    %26 = math.tanh %25 : vector<8x32xf32>
    %27 = arith.mulf %22, %26 : vector<8x32xf32>
    %28 = vector.extract_strided_slice %5 {offsets = [8, 0], sizes = [8, 128], strides = [1, 1]} : vector<64x128xf32> to vector<8x128xf32>
    %cst_11 = arith.constant dense<0.000000e+00> : vector<8x128xf32>
    %29 = tpu.matmul %27, %6, %cst_11 {dimension_numbers = #tpu.dot_dimension_numbers<[1], [0], [0], [1], [0, 0, 1, 1], [], []>} : vector<8x32xf32>, vector<32x128xf32>, vector<8x128xf32> -> vector<8x128xf32>
    %30 = arith.addf %28, %29 : vector<8x128xf32>
    %31 = vector.extract_strided_slice %30 {offsets = [0, 0], sizes = [8, 96], strides = [1, 1]} : vector<8x128xf32> to vector<8x96xf32>
    %32 = arith.negf %31 : vector<8x96xf32>
    %33 = math.exp %32 : vector<8x96xf32>
    %cst_12 = arith.constant 1.000000e+00 : f32
    %34 = vector.broadcast %cst_12 : f32 to vector<8x96xf32>
    %35 = arith.addf %34, %33 : vector<8x96xf32>
    %36 = arith.divf %34, %35 : vector<8x96xf32>
    %37 = vector.extract_strided_slice %30 {offsets = [0, 96], sizes = [8, 32], strides = [1, 1]} : vector<8x128xf32> to vector<8x32xf32>
    %38 = math.tanh %37 : vector<8x32xf32>
    %39 = vector.extract_strided_slice %36 {offsets = [0, 0], sizes = [8, 32], strides = [1, 1]} : vector<8x96xf32> to vector<8x32xf32>
    %40 = vector.extract_strided_slice %36 {offsets = [0, 32], sizes = [8, 32], strides = [1, 1]} : vector<8x96xf32> to vector<8x32xf32>
    %41 = vector.extract_strided_slice %36 {offsets = [0, 64], sizes = [8, 32], strides = [1, 1]} : vector<8x96xf32> to vector<8x32xf32>
    %42 = arith.mulf %40, %25 : vector<8x32xf32>
    %43 = arith.mulf %39, %38 : vector<8x32xf32>
    %44 = arith.addf %42, %43 : vector<8x32xf32>
    %45 = math.tanh %44 : vector<8x32xf32>
    %46 = arith.mulf %41, %45 : vector<8x32xf32>
    %47 = vector.extract_strided_slice %5 {offsets = [16, 0], sizes = [8, 128], strides = [1, 1]} : vector<64x128xf32> to vector<8x128xf32>
    %cst_13 = arith.constant dense<0.000000e+00> : vector<8x128xf32>
    %48 = tpu.matmul %46, %6, %cst_13 {dimension_numbers = #tpu.dot_dimension_numbers<[1], [0], [0], [1], [0, 0, 1, 1], [], []>} : vector<8x32xf32>, vector<32x128xf32>, vector<8x128xf32> -> vector<8x128xf32>
    %49 = arith.addf %47, %48 : vector<8x128xf32>
    %50 = vector.extract_strided_slice %49 {offsets = [0, 0], sizes = [8, 96], strides = [1, 1]} : vector<8x128xf32> to vector<8x96xf32>
    %51 = arith.negf %50 : vector<8x96xf32>
    %52 = math.exp %51 : vector<8x96xf32>
    %cst_14 = arith.constant 1.000000e+00 : f32
    %53 = vector.broadcast %cst_14 : f32 to vector<8x96xf32>
    %54 = arith.addf %53, %52 : vector<8x96xf32>
    %55 = arith.divf %53, %54 : vector<8x96xf32>
    %56 = vector.extract_strided_slice %49 {offsets = [0, 96], sizes = [8, 32], strides = [1, 1]} : vector<8x128xf32> to vector<8x32xf32>
    %57 = math.tanh %56 : vector<8x32xf32>
    %58 = vector.extract_strided_slice %55 {offsets = [0, 0], sizes = [8, 32], strides = [1, 1]} : vector<8x96xf32> to vector<8x32xf32>
    %59 = vector.extract_strided_slice %55 {offsets = [0, 32], sizes = [8, 32], strides = [1, 1]} : vector<8x96xf32> to vector<8x32xf32>
    %60 = vector.extract_strided_slice %55 {offsets = [0, 64], sizes = [8, 32], strides = [1, 1]} : vector<8x96xf32> to vector<8x32xf32>
    %61 = arith.mulf %59, %44 : vector<8x32xf32>
    %62 = arith.mulf %58, %57 : vector<8x32xf32>
    %63 = arith.addf %61, %62 : vector<8x32xf32>
    %64 = math.tanh %63 : vector<8x32xf32>
    %65 = arith.mulf %60, %64 : vector<8x32xf32>
    %66 = vector.extract_strided_slice %5 {offsets = [24, 0], sizes = [8, 128], strides = [1, 1]} : vector<64x128xf32> to vector<8x128xf32>
    %cst_15 = arith.constant dense<0.000000e+00> : vector<8x128xf32>
    %67 = tpu.matmul %65, %6, %cst_15 {dimension_numbers = #tpu.dot_dimension_numbers<[1], [0], [0], [1], [0, 0, 1, 1], [], []>} : vector<8x32xf32>, vector<32x128xf32>, vector<8x128xf32> -> vector<8x128xf32>
    %68 = arith.addf %66, %67 : vector<8x128xf32>
    %69 = vector.extract_strided_slice %68 {offsets = [0, 0], sizes = [8, 96], strides = [1, 1]} : vector<8x128xf32> to vector<8x96xf32>
    %70 = arith.negf %69 : vector<8x96xf32>
    %71 = math.exp %70 : vector<8x96xf32>
    %cst_16 = arith.constant 1.000000e+00 : f32
    %72 = vector.broadcast %cst_16 : f32 to vector<8x96xf32>
    %73 = arith.addf %72, %71 : vector<8x96xf32>
    %74 = arith.divf %72, %73 : vector<8x96xf32>
    %75 = vector.extract_strided_slice %68 {offsets = [0, 96], sizes = [8, 32], strides = [1, 1]} : vector<8x128xf32> to vector<8x32xf32>
    %76 = math.tanh %75 : vector<8x32xf32>
    %77 = vector.extract_strided_slice %74 {offsets = [0, 0], sizes = [8, 32], strides = [1, 1]} : vector<8x96xf32> to vector<8x32xf32>
    %78 = vector.extract_strided_slice %74 {offsets = [0, 32], sizes = [8, 32], strides = [1, 1]} : vector<8x96xf32> to vector<8x32xf32>
    %79 = vector.extract_strided_slice %74 {offsets = [0, 64], sizes = [8, 32], strides = [1, 1]} : vector<8x96xf32> to vector<8x32xf32>
    %80 = arith.mulf %78, %63 : vector<8x32xf32>
    %81 = arith.mulf %77, %76 : vector<8x32xf32>
    %82 = arith.addf %80, %81 : vector<8x32xf32>
    %83 = math.tanh %82 : vector<8x32xf32>
    %84 = arith.mulf %79, %83 : vector<8x32xf32>
    %85 = vector.extract_strided_slice %5 {offsets = [32, 0], sizes = [8, 128], strides = [1, 1]} : vector<64x128xf32> to vector<8x128xf32>
    %cst_17 = arith.constant dense<0.000000e+00> : vector<8x128xf32>
    %86 = tpu.matmul %84, %6, %cst_17 {dimension_numbers = #tpu.dot_dimension_numbers<[1], [0], [0], [1], [0, 0, 1, 1], [], []>} : vector<8x32xf32>, vector<32x128xf32>, vector<8x128xf32> -> vector<8x128xf32>
    %87 = arith.addf %85, %86 : vector<8x128xf32>
    %88 = vector.extract_strided_slice %87 {offsets = [0, 0], sizes = [8, 96], strides = [1, 1]} : vector<8x128xf32> to vector<8x96xf32>
    %89 = arith.negf %88 : vector<8x96xf32>
    %90 = math.exp %89 : vector<8x96xf32>
    %cst_18 = arith.constant 1.000000e+00 : f32
    %91 = vector.broadcast %cst_18 : f32 to vector<8x96xf32>
    %92 = arith.addf %91, %90 : vector<8x96xf32>
    %93 = arith.divf %91, %92 : vector<8x96xf32>
    %94 = vector.extract_strided_slice %87 {offsets = [0, 96], sizes = [8, 32], strides = [1, 1]} : vector<8x128xf32> to vector<8x32xf32>
    %95 = math.tanh %94 : vector<8x32xf32>
    %96 = vector.extract_strided_slice %93 {offsets = [0, 0], sizes = [8, 32], strides = [1, 1]} : vector<8x96xf32> to vector<8x32xf32>
    %97 = vector.extract_strided_slice %93 {offsets = [0, 32], sizes = [8, 32], strides = [1, 1]} : vector<8x96xf32> to vector<8x32xf32>
    %98 = vector.extract_strided_slice %93 {offsets = [0, 64], sizes = [8, 32], strides = [1, 1]} : vector<8x96xf32> to vector<8x32xf32>
    %99 = arith.mulf %97, %82 : vector<8x32xf32>
    %100 = arith.mulf %96, %95 : vector<8x32xf32>
    %101 = arith.addf %99, %100 : vector<8x32xf32>
    %102 = math.tanh %101 : vector<8x32xf32>
    %103 = arith.mulf %98, %102 : vector<8x32xf32>
    %104 = vector.extract_strided_slice %5 {offsets = [40, 0], sizes = [8, 128], strides = [1, 1]} : vector<64x128xf32> to vector<8x128xf32>
    %cst_19 = arith.constant dense<0.000000e+00> : vector<8x128xf32>
    %105 = tpu.matmul %103, %6, %cst_19 {dimension_numbers = #tpu.dot_dimension_numbers<[1], [0], [0], [1], [0, 0, 1, 1], [], []>} : vector<8x32xf32>, vector<32x128xf32>, vector<8x128xf32> -> vector<8x128xf32>
    %106 = arith.addf %104, %105 : vector<8x128xf32>
    %107 = vector.extract_strided_slice %106 {offsets = [0, 0], sizes = [8, 96], strides = [1, 1]} : vector<8x128xf32> to vector<8x96xf32>
    %108 = arith.negf %107 : vector<8x96xf32>
    %109 = math.exp %108 : vector<8x96xf32>
    %cst_20 = arith.constant 1.000000e+00 : f32
    %110 = vector.broadcast %cst_20 : f32 to vector<8x96xf32>
    %111 = arith.addf %110, %109 : vector<8x96xf32>
    %112 = arith.divf %110, %111 : vector<8x96xf32>
    %113 = vector.extract_strided_slice %106 {offsets = [0, 96], sizes = [8, 32], strides = [1, 1]} : vector<8x128xf32> to vector<8x32xf32>
    %114 = math.tanh %113 : vector<8x32xf32>
    %115 = vector.extract_strided_slice %112 {offsets = [0, 0], sizes = [8, 32], strides = [1, 1]} : vector<8x96xf32> to vector<8x32xf32>
    %116 = vector.extract_strided_slice %112 {offsets = [0, 32], sizes = [8, 32], strides = [1, 1]} : vector<8x96xf32> to vector<8x32xf32>
    %117 = vector.extract_strided_slice %112 {offsets = [0, 64], sizes = [8, 32], strides = [1, 1]} : vector<8x96xf32> to vector<8x32xf32>
    %118 = arith.mulf %116, %101 : vector<8x32xf32>
    %119 = arith.mulf %115, %114 : vector<8x32xf32>
    %120 = arith.addf %118, %119 : vector<8x32xf32>
    %121 = math.tanh %120 : vector<8x32xf32>
    %122 = arith.mulf %117, %121 : vector<8x32xf32>
    %123 = vector.extract_strided_slice %5 {offsets = [48, 0], sizes = [8, 128], strides = [1, 1]} : vector<64x128xf32> to vector<8x128xf32>
    %cst_21 = arith.constant dense<0.000000e+00> : vector<8x128xf32>
    %124 = tpu.matmul %122, %6, %cst_21 {dimension_numbers = #tpu.dot_dimension_numbers<[1], [0], [0], [1], [0, 0, 1, 1], [], []>} : vector<8x32xf32>, vector<32x128xf32>, vector<8x128xf32> -> vector<8x128xf32>
    %125 = arith.addf %123, %124 : vector<8x128xf32>
    %126 = vector.extract_strided_slice %125 {offsets = [0, 0], sizes = [8, 96], strides = [1, 1]} : vector<8x128xf32> to vector<8x96xf32>
    %127 = arith.negf %126 : vector<8x96xf32>
    %128 = math.exp %127 : vector<8x96xf32>
    %cst_22 = arith.constant 1.000000e+00 : f32
    %129 = vector.broadcast %cst_22 : f32 to vector<8x96xf32>
    %130 = arith.addf %129, %128 : vector<8x96xf32>
    %131 = arith.divf %129, %130 : vector<8x96xf32>
    %132 = vector.extract_strided_slice %125 {offsets = [0, 96], sizes = [8, 32], strides = [1, 1]} : vector<8x128xf32> to vector<8x32xf32>
    %133 = math.tanh %132 : vector<8x32xf32>
    %134 = vector.extract_strided_slice %131 {offsets = [0, 0], sizes = [8, 32], strides = [1, 1]} : vector<8x96xf32> to vector<8x32xf32>
    %135 = vector.extract_strided_slice %131 {offsets = [0, 32], sizes = [8, 32], strides = [1, 1]} : vector<8x96xf32> to vector<8x32xf32>
    %136 = vector.extract_strided_slice %131 {offsets = [0, 64], sizes = [8, 32], strides = [1, 1]} : vector<8x96xf32> to vector<8x32xf32>
    %137 = arith.mulf %135, %120 : vector<8x32xf32>
    %138 = arith.mulf %134, %133 : vector<8x32xf32>
    %139 = arith.addf %137, %138 : vector<8x32xf32>
    %140 = math.tanh %139 : vector<8x32xf32>
    %141 = arith.mulf %136, %140 : vector<8x32xf32>
    %142 = vector.extract_strided_slice %5 {offsets = [56, 0], sizes = [8, 128], strides = [1, 1]} : vector<64x128xf32> to vector<8x128xf32>
    %cst_23 = arith.constant dense<0.000000e+00> : vector<8x128xf32>
    %143 = tpu.matmul %141, %6, %cst_23 {dimension_numbers = #tpu.dot_dimension_numbers<[1], [0], [0], [1], [0, 0, 1, 1], [], []>} : vector<8x32xf32>, vector<32x128xf32>, vector<8x128xf32> -> vector<8x128xf32>
    %144 = arith.addf %142, %143 : vector<8x128xf32>
    %145 = vector.extract_strided_slice %144 {offsets = [0, 0], sizes = [8, 96], strides = [1, 1]} : vector<8x128xf32> to vector<8x96xf32>
    %146 = arith.negf %145 : vector<8x96xf32>
    %147 = math.exp %146 : vector<8x96xf32>
    %cst_24 = arith.constant 1.000000e+00 : f32
    %148 = vector.broadcast %cst_24 : f32 to vector<8x96xf32>
    %149 = arith.addf %148, %147 : vector<8x96xf32>
    %150 = arith.divf %148, %149 : vector<8x96xf32>
    %151 = vector.extract_strided_slice %144 {offsets = [0, 96], sizes = [8, 32], strides = [1, 1]} : vector<8x128xf32> to vector<8x32xf32>
    %152 = math.tanh %151 : vector<8x32xf32>
    %153 = vector.extract_strided_slice %150 {offsets = [0, 0], sizes = [8, 32], strides = [1, 1]} : vector<8x96xf32> to vector<8x32xf32>
    %154 = vector.extract_strided_slice %150 {offsets = [0, 32], sizes = [8, 32], strides = [1, 1]} : vector<8x96xf32> to vector<8x32xf32>
    %155 = vector.extract_strided_slice %150 {offsets = [0, 64], sizes = [8, 32], strides = [1, 1]} : vector<8x96xf32> to vector<8x32xf32>
    %156 = arith.mulf %154, %139 : vector<8x32xf32>
    %157 = arith.mulf %153, %152 : vector<8x32xf32>
    %158 = arith.addf %156, %157 : vector<8x32xf32>
    %159 = math.tanh %158 : vector<8x32xf32>
    %160 = arith.mulf %155, %159 : vector<8x32xf32>
    %c0_25 = arith.constant 0 : index
    %c0_26 = arith.constant 0 : index
    %161 = vector.load %arg4[%c0_25, %c0_26] : memref<32x1xf32, #tpu.memory_space<vmem>>, vector<32x1xf32>
    %cst_27 = arith.constant dense<0.000000e+00> : vector<8x1xf32>
    %162 = tpu.matmul %160, %161, %cst_27 {dimension_numbers = #tpu.dot_dimension_numbers<[1], [0], [0], [1], [0, 0, 1, 1], [], []>} : vector<8x32xf32>, vector<32x1xf32>, vector<8x1xf32> -> vector<8x1xf32>
    %c0_28 = arith.constant 0 : index
    %c0_29 = arith.constant 0 : index
    %163 = vector.load %arg5[%c0_28, %c0_29] : memref<1x1xf32, #tpu.memory_space<vmem>>, vector<1x1xf32>
    %164 = vector.broadcast %163 : vector<1x1xf32> to vector<8x1xf32>
    %165 = arith.addf %162, %164 : vector<8x1xf32>
    %c0_30 = arith.constant 0 : index
    %c0_31 = arith.constant 0 : index
    %166 = vector.load %arg6[%c0_30, %c0_31] : memref<8x1xf32, #tpu.memory_space<vmem>>, vector<8x1xf32>
    tpu.vector_store %arg6[%c0_30, %c0_31], %165 {strides = array<i32>} : memref<8x1xf32, #tpu.memory_space<vmem>>, vector<8x1xf32>,
    return
  }
}

</mosaic_0001>

<bundles_post_ra>
// kernel: model_forward.1
= control target key start
LH: loop header
LB: loop body
LE: loop exit
PB: predicated region body
PF: predicated region fallthrough
CT: control target
= control target key end

     0   :  { %vm78_vm0 = vcmask 1043456   ;;  %v1380_v2 = vmov 0.0   ;;  %vm1381_vm1 = vmmov 0   ;;  %vm53_vm2 = vcmask 818176   ;;  %s1382_s11 = smov 32   ;;  %s1668_s1 = inlined_call_operand.vmem [shape: f32[100,128], index: 1, kind: input, shape index: {}]   ;;  %s1669_s2 = inlined_call_operand.vmem [shape: f32[32,128], index: 2, kind: input, shape index: {}]   ;;  %s1670_s0 = inlined_call_operand.vmem [shape: f32[64,100], index: 0, kind: input, shape index: {}]   ;;  %s1671_s3 = inlined_call_operand.vmem [shape: f32[1,128], index: 3, kind: input, shape index: {}]   ;;  %s1672_s4 = inlined_call_operand.vmem [shape: f32[32,1], index: 4, kind: input, shape index: {}]   ;;  %s1673_s5 = inlined_call_operand.<no memory space> [shape: f32[1,1], index: 5, kind: input, shape index: {}]   ;;  %s1674_s6 = inlined_call_operand.vmem [shape: f32[8,1], index: 6, kind: output, shape index: {}]  }
   0x1   :  { %v45_v0 = vld [vmem:[%s1668_s1 + $0x60] sm:$0xf]  ;;  %v44_v1 = vld [vmem:[%s1668_s1 + $0x58] sm:$0xff]  ;;  %1213 = vmatprep.subr.mxu1 %v1380_v2  ;;  %1221 = vmatprep.mubr.msk.f32.mxu1 %vm1381_vm1, %v1380_v2  ;;  %v43_v3 = vld [vmem:[%s1668_s1 + $0x50] sm:$0xff]  ;;  %vm191_vm3 = vcmask 261120   ;;  %vm1076_vm4 = vcmask 7168  }
   0x2   :  { %1175 = vmatprep.subr.msk.mxu0 %vm78_vm0, %v45_v0  ;;  %v1434_v4 = vld [vmem:[%s1669_s2 + $0x18] sm:$0xff]  ;;  %v42_v5 = vld [vmem:[%s1668_s1 + $0x48] sm:$0xff]  ;;  %v1443_v6 = vld [vmem:[%s1669_s2 + $0x10] sm:$0xff] }
   0x3   :  { %1176 = vmatpush3.msk.msra.mxu0 %vm78_vm0, %v45_v0  ;;  %1214 = vmatpush3.msra.mxu1 %v1434_v4  ;;  %v25_v7 = vld [vmem:[%s1670_s0] sm:$0xff]  ;;  %v1456_v9 = vld [vmem:[%s1669_s2 + $0x8] sm:$0xff]  ;;  %v40_v10 = vld [vmem:[%s1668_s1 + $0x38] sm:$0xff] }
   0x4   :  { %1177 = vmatprep.subr.mxu0 %v44_v1  ;;  %1215 = vmatprep.subr.mxu1 %v1380_v2  ;;  %v41_v8 = vld [vmem:[%s1668_s1 + $0x40] sm:$0xff]  ;;  %v39_v12 = vld [vmem:[%s1668_s1 + $0x30] sm:$0xff]  ;;  %v38_v13 = vld [vmem:[%s1668_s1 + $0x28] sm:$0xff] }
   0x5   :  { %1178 = vmatpush3.msra.mxu0 %v44_v1  ;;  %1216 = vmatpush3.msra.mxu1 %v1443_v6  ;;  %v1466_v11 = vld [vmem:[%s1669_s2] sm:$0xff]  ;;  %v36_v15 = vld [vmem:[%s1668_s1 + $0x18] sm:$0xff]  ;;  %v35_v16 = vld [vmem:[%s1668_s1 + $0x10] sm:$0xff] }
   0x6   :  { %1179 = vmatprep.subr.mxu0 %v43_v3  ;;  %1217 = vmatprep.subr.mxu1 %v1380_v2  ;;  %v37_v14 = vld [vmem:[%s1668_s1 + $0x20] sm:$0xff]  ;;  %v34_v17 = vld [vmem:[%s1668_s1 + $0x8] sm:$0xff]  ;;  %v27_v55 = vld [vmem:[%s1670_s0 + $0x10] sm:$0xff] }
   0x7   :  { %1180 = vmatpush3.msra.mxu0 %v43_v3  ;;  %1201 = vmatprep.mubr.msk.f32.mxu0 %vm53_vm2, %v25_v7  ;;  %v33_v18 = vld [vmem:[%s1668_s1] sm:$0xff]  ;;  %v26_v19 = vld [vmem:[%s1670_s0 + $0x8] sm:$0xff]  ;;  %v28_v56 = vld [vmem:[%s1670_s0 + $0x18] sm:$0xff] }
   0x8   :  { %1181 = vmatprep.subr.mxu0 %v42_v5  ;;  %1218 = vmatpush3.msra.mxu1 %v1456_v9  ;;  %v1520_v23 = vld [vmem:[%s1671_s3] ss:$0 sm:$0xff]  ;;  %s1383_s3 = smov 64  }
   0x9   :  { %1182 = vmatpush3.msra.mxu0 %v42_v5  ;;  %1219 = vmatprep.subr.mxu1 %v1380_v2 }
   0xa   :  { %1183 = vmatprep.subr.mxu0 %v41_v8  ;;  %1220 = vmatpush3.msra.mxu1 %v1466_v11 }
   0xb   :  { %1184 = vmatpush3.msra.mxu0 %v41_v8  ;;  %1222 = vmatmul.mubr.f32.vlgmr.msra.gmra.mxu1 %v1380_v2 }
   0xc   :  { %1185 = vmatprep.subr.mxu0 %v40_v10  ;;  %1224 = vmatprep.subr.mxu1 %v1380_v2 }
   0xd   :  { %1186 = vmatpush3.msra.mxu0 %v40_v10  ;;  %1225 = vmatpush3.msra.mxu1 %v1434_v4 }
   0xe   :  { %1187 = vmatprep.subr.mxu0 %v39_v12  ;;  %1226 = vmatprep.subr.mxu1 %v1380_v2 }
   0xf   :  { %1188 = vmatpush3.msra.mxu0 %v39_v12  ;;  %1227 = vmatpush3.msra.mxu1 %v1443_v6 }
  0x10   :  { %1189 = vmatprep.subr.mxu0 %v38_v13  ;;  %1228 = vmatprep.subr.mxu1 %v1380_v2 }
  0x11   :  { %1190 = vmatpush3.msra.mxu0 %v38_v13  ;;  %1229 = vmatpush3.msra.mxu1 %v1456_v9 }
  0x12   :  { %1191 = vmatprep.subr.mxu0 %v37_v14  ;;  %1230 = vmatprep.subr.mxu1 %v1380_v2 }
  0x13   :  { %1192 = vmatpush3.msra.mxu0 %v37_v14  ;;  %1231 = vmatpush3.msra.mxu1 %v1466_v11 }
  0x14   :  { %1193 = vmatprep.subr.mxu0 %v36_v15  ;;  %1232 = vmatprep.mubr.msk.f32.mxu1 %vm1381_vm1, %v1380_v2 }
  0x15   :  { %1194 = vmatpush3.msra.mxu0 %v36_v15  ;;  %1235 = vmatprep.subr.mxu1 %v1380_v2 }
  0x16   :  { %1195 = vmatprep.subr.mxu0 %v35_v16 }
  0x17   :  { %1196 = vmatpush3.msra.mxu0 %v35_v16 }
  0x18   :  { %1197 = vmatprep.subr.mxu0 %v34_v17 }
  0x19   :  { %1198 = vmatpush3.msra.mxu0 %v34_v17 }
  0x1a   :  { %1199 = vmatprep.subr.mxu0 %v33_v18 }
  0x1b   :  { %1200 = vmatpush3.msra.mxu0 %v33_v18 }
  0x1c   :  { %1202 = vmatmul.mubr.msk.f32.vlgmr.msra.gmra.mxu0 %vm53_vm2, %v26_v19  ;;  %1268 = vmatprep.subr.mxu0 %v1380_v2 }
  0x1d   :  { %1269 = vmatpush3.msra.mxu0 %v1434_v4  ;;  %1204 = vmatprep.mubr.msk.f32.mxu0 %vm53_vm2, %v27_v55 }
  0x1e   :  { %1270 = vmatprep.subr.mxu0 %v1380_v2 }
  0x1f   :  { %1271 = vmatpush3.msra.mxu0 %v1443_v6 }
  0x20   :  { %1272 = vmatprep.subr.mxu0 %v1380_v2  ;;  %1205 = vmatmul.mubr.msk.f32.gmra.mxu0 %vm53_vm2, %v28_v56 }
  0x21   :  { %1273 = vmatpush3.msra.mxu0 %v1456_v9 }
  0x22   :  { %1274 = vmatprep.subr.mxu0 %v1380_v2 }
  0x23   :  { %1275 = vmatpush3.msra.mxu0 %v1466_v11 }
  0x24   :  { %1290 = vmatprep.subr.mxu0 %v1380_v2 }
  0xcb   :  { %v261_v20 = vpop.f32.mrf.mxu1 }
  0xcd   :  { %v1223_v21 = vpop.f32.mrf.mxu1 }
  0xdc   :  { %v1203_v22 = vpop.f32.mrf.mxu0 }
  0xdd   :  { %v154_v41 = vadd.f32 %v1203_v22, %v1520_v23 }
  0xde   :  { %v148_v24 = vpop.f32.mrf.mxu0 }
  0xdf   :  { %v149_v25 = vadd.f32 %v1520_v23, %v148_v24 }
  0xe0   :  { %v1206_v61 = vpop.f32.mrf.mxu0 }
  0xe1   :  { %v265_v26 = vadd.f32 %v261_v20, %v149_v25  ;;  %v164_v22 = vadd.f32 %v1206_v61, %v1520_v23 }
  0xe2   :  { %v158_v62 = vpop.f32.mrf.mxu0 }
  0xe3   :  { %1316 = vtanh.f32 %v265_v26  ;;  %v1092_v28 = vmul.f32 -1.442695, %v265_v26  ;;  %v159_v63 = vadd.f32 %v1520_v23, %v158_v62 }
  0xe5   :  { %1318 = vpow2.f32 %v1092_v28 }
  0xf0   :  { %v1317_v27 = vpop.eup %1316 }
  0xf1   :  { %275 = vrot.lane.b32.xlu0 %v1317_v27, %s1382_s11 }
  0xf2   :  { %v1319_v29 = vpop.eup %1318 }
  0xf3   :  { %v269_v30 = vadd.f32 1.0, %v1319_v29 }
  0xf5   :  { %1320 = vrcp.f32 %v269_v30 }
 0x102   :  { %v1321_v31 = vpop.eup %1320 }
 0x103   :  { %v273_v34 = vmul.f32 0.0, %v1321_v31 }
 0x163   :  { %v276_v32 = vpop.permute.xlu0 %275 }
 0x164   :  { %v278_v33 = vmul.f32 %v1321_v31, %v276_v32 }
 0x166   :  { %280 = vrot.lane.b32.xlu0 %v278_v33, %s1382_s11 }
 0x1d8   :  { %v281_v35 = vpop.permute.xlu0 %280 }
 0x1d9   :  { %v283_v36 = vadd.f32 %v281_v35, %v273_v34 }
 0x1db   :  { %1322 = vtanh.f32 %v283_v36 }
 0x1e8   :  { %v1323_v37 = vpop.eup %1322 }
 0x1e9   :  { %286 = vrot.lane.b32.xlu1 %v1323_v37, %s1382_s11  ;;  %v29_v37 = vld [vmem:[%s1670_s0 + $0x20] sm:$0xff] }
 0x1ea   :  { %1207 = vmatprep.mubr.msk.f32.mxu0 %vm53_vm2, %v29_v37 }
 0x25b   :  { %v287_v38 = vpop.permute.xlu1 %286 }
 0x25c   :  { %v289_v39 = vmul.f32 %v1321_v31, %v287_v38  ;;  %v30_v38 = vld [vmem:[%s1670_s0 + $0x28] sm:$0xff] }
 0x25d   :  { %1208 = vmatmul.mubr.msk.f32.gmra.mxu0 %vm53_vm2, %v30_v38 }
 0x25e   :  { %291 = vrot.lane.b32.xlu1 %v289_v39, %s1383_s3 }
 0x2d0   :  { %v292_v40 = vpop.permute.xlu1 %291 }
 0x2d1   :  { %1233 = vmatmul.mubr.msk.f32.vlgmr.msra.gmra.mxu1 %vm191_vm3, %v292_v40 }
 0x2d2   :  { %1236 = vmatpush3.msra.mxu1 %v1434_v4  ;;  %1243 = vmatprep.mubr.msk.f32.mxu1 %vm1381_vm1, %v1380_v2 }
 0x2d3   :  { %1237 = vmatprep.subr.mxu1 %v1380_v2 }
 0x2d4   :  { %1238 = vmatpush3.msra.mxu1 %v1443_v6 }
 0x2d5   :  { %1239 = vmatprep.subr.mxu1 %v1380_v2 }
 0x2d6   :  { %1240 = vmatpush3.msra.mxu1 %v1456_v9 }
 0x2d7   :  { %1241 = vmatprep.subr.mxu1 %v1380_v2 }
 0x2d8   :  { %1242 = vmatpush3.msra.mxu1 %v1466_v11 }
 0x2d9   :  { %1246 = vmatprep.subr.mxu1 %v1380_v2 }
 0x391   :  { %v361_v42 = vpop.f32.mrf.mxu1 }
 0x392   :  { %v365_v43 = vadd.f32 %v361_v42, %v154_v41 }
 0x393   :  { %v1234_v44 = vpop.f32.mrf.mxu1 }
 0x394   :  { %1324 = vtanh.f32 %v365_v43  ;;  %v1094_v46 = vmul.f32 -1.442695, %v365_v43  ;;  %v1209_v43 = vpop.f32.mrf.mxu0 }
 0x396   :  { %1326 = vpow2.f32 %v1094_v46  ;;  %v168_v44 = vpop.f32.mrf.mxu0 }
 0x3a1   :  { %v1325_v45 = vpop.eup %1324 }
 0x3a2   :  { %375 = vrot.lane.b32.xlu0 %v1325_v45, %s1382_s11  ;;  %v169_v45 = vadd.f32 %v1520_v23, %v168_v44 }
 0x3a3   :  { %v1327_v47 = vpop.eup %1326 }
 0x3a4   :  { %v369_v48 = vadd.f32 1.0, %v1327_v47 }
 0x3a6   :  { %1328 = vrcp.f32 %v369_v48 }
 0x3b3   :  { %v1329_v49 = vpop.eup %1328 }
 0x3b4   :  { %v373_v52 = vmul.f32 %v1329_v49, %v283_v36 }
 0x414   :  { %v376_v50 = vpop.permute.xlu0 %375 }
 0x415   :  { %v378_v51 = vmul.f32 %v1329_v49, %v376_v50 }
 0x417   :  { %380 = vrot.lane.b32.xlu1 %v378_v51, %s1382_s11 }
 0x489   :  { %v381_v53 = vpop.permute.xlu1 %380 }
 0x48a   :  { %v383_v54 = vadd.f32 %v381_v53, %v373_v52 }
 0x48c   :  { %1330 = vtanh.f32 %v383_v54 }
 0x499   :  { %v1331_v57 = vpop.eup %1330 }
 0x49a   :  { %386 = vrot.lane.b32.xlu0 %v1331_v57, %s1382_s11 }
 0x50c   :  { %v387_v58 = vpop.permute.xlu0 %386 }
 0x50d   :  { %v389_v59 = vmul.f32 %v1329_v49, %v387_v58 }
 0x50f   :  { %391 = vrot.lane.b32.xlu1 %v389_v59, %s1383_s3  ;;  %v31_v59 = vld [vmem:[%s1670_s0 + $0x30] sm:$0xff] }
 0x510   :  { %1210 = vmatprep.mubr.msk.f32.mxu0 %vm53_vm2, %v31_v59  ;;  %v11_v59 = vstv %s1673_s5 }
 0x511   :  { %12 = vst [vmem:[#allocation2] sm:$0x1] %v11_v59 }
 0x581   :  { %v392_v60 = vpop.permute.xlu1 %391 }
 0x582   :  { %1244 = vmatmul.mubr.msk.f32.vlgmr.msra.gmra.mxu1 %vm191_vm3, %v392_v60  ;;  %v32_v60 = vld [vmem:[%s1670_s0 + $0x38] sm:$0xff] }
 0x583   :  { %1247 = vmatpush3.msra.mxu1 %v1434_v4  ;;  %1254 = vmatprep.mubr.msk.f32.mxu1 %vm1381_vm1, %v1380_v2 }
 0x584   :  { %1248 = vmatprep.subr.mxu1 %v1380_v2  ;;  %1211 = vmatmul.mubr.msk.f32.gmra.mxu0 %vm53_vm2, %v32_v60 }
 0x585   :  { %1249 = vmatpush3.msra.mxu1 %v1443_v6  ;;  %1276 = vmatprep.mubr.msk.f32.mxu0 %vm1381_vm1, %v1380_v2 }
 0x586   :  { %1250 = vmatprep.subr.mxu1 %v1380_v2 }
 0x587   :  { %1251 = vmatpush3.msra.mxu1 %v1456_v9 }
 0x588   :  { %1252 = vmatprep.subr.mxu1 %v1380_v2 }
 0x589   :  { %1253 = vmatpush3.msra.mxu1 %v1466_v11 }
 0x58a   :  { %1257 = vmatprep.subr.mxu1 %v1380_v2 }
 0x642   :  { %v461_v0 = vpop.f32.mrf.mxu1 }
 0x643   :  { %v465_v1 = vadd.f32 %v461_v0, %v159_v63 }
 0x644   :  { %v1245_v3 = vpop.f32.mrf.mxu1 }
 0x645   :  { %1332 = vtanh.f32 %v465_v1  ;;  %v1096_v7 = vmul.f32 -1.442695, %v465_v1  ;;  %v1212_v1 = vpop.f32.mrf.mxu0 }
 0x647   :  { %1334 = vpow2.f32 %v1096_v7  ;;  %v178_v3 = vpop.f32.mrf.mxu0 }
 0x652   :  { %v1333_v5 = vpop.eup %1332 }
 0x653   :  { %475 = vrot.lane.b32.xlu0 %v1333_v5, %s1382_s11  ;;  %v174_v5 = vadd.f32 %v1209_v43, %v1520_v23 }
 0x654   :  { %v1335_v8 = vpop.eup %1334 }
 0x655   :  { %v469_v10 = vadd.f32 1.0, %v1335_v8 }
 0x657   :  { %1336 = vrcp.f32 %v469_v10 }
 0x664   :  { %v1337_v12 = vpop.eup %1336 }
 0x665   :  { %v473_v15 = vmul.f32 %v1337_v12, %v383_v54 }
 0x6c5   :  { %v476_v13 = vpop.permute.xlu0 %475 }
 0x6c6   :  { %v478_v14 = vmul.f32 %v1337_v12, %v476_v13 }
 0x6c8   :  { %480 = vrot.lane.b32.xlu1 %v478_v14, %s1382_s11 }
 0x73a   :  { %v481_v16 = vpop.permute.xlu1 %480 }
 0x73b   :  { %v483_v17 = vadd.f32 %v481_v16, %v473_v15 }
 0x73d   :  { %1338 = vtanh.f32 %v483_v17 }
 0x74a   :  { %v1339_v18 = vpop.eup %1338 }
 0x74b   :  { %486 = vrot.lane.b32.xlu0 %v1339_v18, %s1382_s11 }
 0x7bd   :  { %v487_v19 = vpop.permute.xlu0 %486 }
 0x7be   :  { %v489_v20 = vmul.f32 %v1337_v12, %v487_v19 }
 0x7c0   :  { %491 = vrot.lane.b32.xlu1 %v489_v20, %s1383_s3 }
 0x832   :  { %v492_v21 = vpop.permute.xlu1 %491 }
 0x833   :  { %1255 = vmatmul.mubr.msk.f32.vlgmr.msra.gmra.mxu1 %vm191_vm3, %v492_v21 }
 0x834   :  { %1258 = vmatpush3.msra.mxu1 %v1434_v4  ;;  %1265 = vmatprep.mubr.msk.f32.mxu1 %vm1381_vm1, %v1380_v2 }
 0x835   :  { %1259 = vmatprep.subr.mxu1 %v1380_v2 }
 0x836   :  { %1260 = vmatpush3.msra.mxu1 %v1443_v6 }
 0x837   :  { %1261 = vmatprep.subr.mxu1 %v1380_v2 }
 0x838   :  { %1262 = vmatpush3.msra.mxu1 %v1456_v9 }
 0x839   :  { %1263 = vmatprep.subr.mxu1 %v1380_v2 }
 0x83a   :  { %1264 = vmatpush3.msra.mxu1 %v1466_v11 }
 0x83b   :  { %1279 = vmatprep.subr.mxu1 %v1380_v2 }
 0x8f3   :  { %v561_v24 = vpop.f32.mrf.mxu1 }
 0x8f4   :  { %v565_v25 = vadd.f32 %v561_v24, %v164_v22  ;;  %v179_v22 = vadd.f32 %v1520_v23, %v178_v3 }
 0x8f5   :  { %v1256_v26 = vpop.f32.mrf.mxu1 }
 0x8f6   :  { %1340 = vtanh.f32 %v565_v25  ;;  %v1098_v28 = vmul.f32 -1.442695, %v565_v25 }
 0x8f8   :  { %1342 = vpow2.f32 %v1098_v28 }
 0x903   :  { %v1341_v27 = vpop.eup %1340 }
 0x904   :  { %575 = vrot.lane.b32.xlu0 %v1341_v27, %s1382_s11 }
 0x905   :  { %v1343_v29 = vpop.eup %1342 }
 0x906   :  { %v569_v30 = vadd.f32 1.0, %v1343_v29 }
 0x908   :  { %1344 = vrcp.f32 %v569_v30 }
 0x915   :  { %v1345_v31 = vpop.eup %1344 }
 0x916   :  { %v573_v34 = vmul.f32 %v1345_v31, %v483_v17 }
 0x976   :  { %v576_v32 = vpop.permute.xlu0 %575 }
 0x977   :  { %v578_v33 = vmul.f32 %v1345_v31, %v576_v32 }
 0x979   :  { %580 = vrot.lane.b32.xlu1 %v578_v33, %s1382_s11 }
 0x9eb   :  { %v581_v35 = vpop.permute.xlu1 %580 }
 0x9ec   :  { %v583_v36 = vadd.f32 %v581_v35, %v573_v34 }
 0x9ee   :  { %1346 = vtanh.f32 %v583_v36 }
 0x9fb   :  { %v1347_v39 = vpop.eup %1346 }
 0x9fc   :  { %586 = vrot.lane.b32.xlu0 %v1347_v39, %s1382_s11 }
 0xa6e   :  { %v587_v40 = vpop.permute.xlu0 %586 }
 0xa6f   :  { %v589_v41 = vmul.f32 %v1345_v31, %v587_v40 }
 0xa71   :  { %591 = vrot.lane.b32.xlu1 %v589_v41, %s1383_s3  ;;  %v184_v41 = vadd.f32 %v1212_v1, %v1520_v23 }
 0xae3   :  { %v592_v42 = vpop.permute.xlu1 %591 }
 0xae4   :  { %1266 = vmatmul.mubr.msk.f32.vlgmr.msra.gmra.mxu1 %vm191_vm3, %v592_v42 }
 0xae5   :  { %1280 = vmatpush3.msra.mxu1 %v1434_v4  ;;  %1287 = vmatprep.mubr.msk.f32.mxu1 %vm1381_vm1, %v1380_v2 }
 0xae6   :  { %1281 = vmatprep.subr.mxu1 %v1380_v2 }
 0xae7   :  { %1282 = vmatpush3.msra.mxu1 %v1443_v6 }
 0xae8   :  { %1283 = vmatprep.subr.mxu1 %v1380_v2 }
 0xae9   :  { %1284 = vmatpush3.msra.mxu1 %v1456_v9 }
 0xaea   :  { %1285 = vmatprep.subr.mxu1 %v1380_v2 }
 0xaeb   :  { %1286 = vmatpush3.msra.mxu1 %v1466_v11 }
 0xaec   :  { %1301 = vmatprep.subr.mxu1 %v1380_v2 }
 0xba4   :  { %v661_v46 = vpop.f32.mrf.mxu1 }
 0xba5   :  { %v665_v47 = vadd.f32 %v661_v46, %v169_v45 }
 0xba6   :  { %v1267_v48 = vpop.f32.mrf.mxu1 }
 0xba7   :  { %1348 = vtanh.f32 %v665_v47  ;;  %v1100_v50 = vmul.f32 -1.442695, %v665_v47 }
 0xba9   :  { %1350 = vpow2.f32 %v1100_v50 }
 0xbb4   :  { %v1349_v49 = vpop.eup %1348 }
 0xbb5   :  { %675 = vrot.lane.b32.xlu0 %v1349_v49, %s1382_s11 }
 0xbb6   :  { %v1351_v51 = vpop.eup %1350 }
 0xbb7   :  { %v669_v52 = vadd.f32 1.0, %v1351_v51 }
 0xbb9   :  { %1352 = vrcp.f32 %v669_v52 }
 0xbc6   :  { %v1353_v53 = vpop.eup %1352 }
 0xbc7   :  { %v673_v56 = vmul.f32 %v1353_v53, %v583_v36 }
 0xc27   :  { %v676_v54 = vpop.permute.xlu0 %675 }
 0xc28   :  { %v678_v55 = vmul.f32 %v1353_v53, %v676_v54  ;;  %v993_v54 = vld [vmem:[%s1672_s4 + $0x18] sm:$0xff] }
 0xc2a   :  { %680 = vrot.lane.b32.xlu1 %v678_v55, %s1382_s11  ;;  %v992_v55 = vld [vmem:[%s1672_s4 + $0x10] sm:$0xff] }
 0xc9c   :  { %v681_v57 = vpop.permute.xlu1 %680 }
 0xc9d   :  { %v683_v58 = vadd.f32 %v681_v57, %v673_v56  ;;  %v991_v56 = vld [vmem:[%s1672_s4 + $0x8] sm:$0xff]  ;;  %v990_v57 = vld [vmem:[%s1672_s4] sm:$0xff] }
 0xc9f   :  { %1354 = vtanh.f32 %v683_v58 }
 0xcac   :  { %v1355_v61 = vpop.eup %1354 }
 0xcad   :  { %686 = vrot.lane.b32.xlu0 %v1355_v61, %s1382_s11 }
 0xd1f   :  { %v687_v62 = vpop.permute.xlu0 %686 }
 0xd20   :  { %v689_v63 = vmul.f32 %v1353_v53, %v687_v62 }
 0xd22   :  { %691 = vrot.lane.b32.xlu1 %v689_v63, %s1383_s3  ;;  %v1107_v63 = vld [vmem:[#allocation2] ss:$0 sm:$0xff] }
 0xd94   :  { %v692_v0 = vpop.permute.xlu1 %691 }
 0xd95   :  { %1277 = vmatmul.mubr.msk.f32.vlgmr.msra.gmra.mxu0 %vm191_vm3, %v692_v0 }
 0xd96   :  { %1291 = vmatpush3.msra.mxu0 %v1434_v4  ;;  %1298 = vmatprep.mubr.msk.f32.mxu0 %vm1381_vm1, %v1380_v2 }
 0xd97   :  { %1292 = vmatprep.subr.mxu0 %v1380_v2 }
 0xd98   :  { %1293 = vmatpush3.msra.mxu0 %v1443_v6 }
 0xd99   :  { %1294 = vmatprep.subr.mxu0 %v1380_v2 }
 0xd9a   :  { %1295 = vmatpush3.msra.mxu0 %v1456_v9 }
 0xd9b   :  { %1296 = vmatprep.subr.mxu0 %v1380_v2 }
 0xd9c   :  { %1297 = vmatpush3.msra.mxu0 %v1466_v11 }
 0xe55   :  { %v761_v4 = vpop.f32.mrf.mxu0 }
 0xe56   :  { %v765_v7 = vadd.f32 %v761_v4, %v174_v5 }
 0xe57   :  { %v1278_v8 = vpop.f32.mrf.mxu0 }
 0xe58   :  { %1356 = vtanh.f32 %v765_v7  ;;  %v1102_v6 = vmul.f32 -1.442695, %v765_v7 }
 0xe5a   :  { %1358 = vpow2.f32 %v1102_v6 }
 0xe65   :  { %v1357_v10 = vpop.eup %1356 }
 0xe66   :  { %775 = vrot.lane.b32.xlu0 %v1357_v10, %s1382_s11 }
 0xe67   :  { %v1359_v12 = vpop.eup %1358 }
 0xe68   :  { %v769_v13 = vadd.f32 1.0, %v1359_v12 }
 0xe6a   :  { %1360 = vrcp.f32 %v769_v13 }
 0xe77   :  { %v1361_v9 = vpop.eup %1360 }
 0xe78   :  { %v773_v11 = vmul.f32 %v1361_v9, %v683_v58 }
 0xed8   :  { %v776_v14 = vpop.permute.xlu0 %775 }
 0xed9   :  { %v778_v15 = vmul.f32 %v1361_v9, %v776_v14 }
 0xedb   :  { %780 = vrot.lane.b32.xlu1 %v778_v15, %s1382_s11 }
 0xf4d   :  { %v781_v16 = vpop.permute.xlu1 %780 }
 0xf4e   :  { %v783_v17 = vadd.f32 %v781_v16, %v773_v11 }
 0xf50   :  { %1362 = vtanh.f32 %v783_v17 }
 0xf5d   :  { %v1363_v18 = vpop.eup %1362 }
 0xf5e   :  { %786 = vrot.lane.b32.xlu0 %v1363_v18, %s1382_s11 }
 0xfd0   :  { %v787_v19 = vpop.permute.xlu0 %786 }
 0xfd1   :  { %v789_v20 = vmul.f32 %v1361_v9, %v787_v19 }
 0xfd3   :  { %791 = vrot.lane.b32.xlu1 %v789_v20, %s1383_s3 }
0x1045   :  { %v792_v21 = vpop.permute.xlu1 %791 }
0x1046   :  { %1288 = vmatmul.mubr.msk.f32.vlgmr.msra.gmra.mxu1 %vm191_vm3, %v792_v21 }
0x1047   :  { %1309 = vmatprep.mubr.msk.f32.mxu1 %vm1381_vm1, %v1380_v2  ;;  %1302 = vmatpush3.msra.mxu1 %v993_v54 }
0x1048   :  { %1303 = vmatprep.subr.mxu1 %v1380_v2 }
0x1049   :  { %1304 = vmatpush3.msra.mxu1 %v992_v55 }
0x104a   :  { %1305 = vmatprep.subr.mxu1 %v1380_v2 }
0x104b   :  { %1306 = vmatpush3.msra.mxu1 %v991_v56 }
0x104c   :  { %1307 = vmatprep.subr.mxu1 %v1380_v2 }
0x104d   :  { %1308 = vmatpush3.msra.mxu1 %v990_v57 }
0x1106   :  { %v861_v24 = vpop.f32.mrf.mxu1 }
0x1107   :  { %v865_v25 = vadd.f32 %v861_v24, %v179_v22 }
0x1108   :  { %v1289_v26 = vpop.f32.mrf.mxu1 }
0x1109   :  { %1364 = vtanh.f32 %v865_v25  ;;  %v1104_v28 = vmul.f32 -1.442695, %v865_v25 }
0x110b   :  { %1366 = vpow2.f32 %v1104_v28 }
0x1116   :  { %v1365_v27 = vpop.eup %1364 }
0x1117   :  { %875 = vrot.lane.b32.xlu0 %v1365_v27, %s1382_s11 }
0x1118   :  { %v1367_v29 = vpop.eup %1366 }
0x1119   :  { %v869_v30 = vadd.f32 1.0, %v1367_v29 }
0x111b   :  { %1368 = vrcp.f32 %v869_v30 }
0x1128   :  { %v1369_v31 = vpop.eup %1368 }
0x1129   :  { %v873_v34 = vmul.f32 %v1369_v31, %v783_v17 }
0x1189   :  { %v876_v32 = vpop.permute.xlu0 %875 }
0x118a   :  { %v878_v33 = vmul.f32 %v1369_v31, %v876_v32 }
0x118c   :  { %880 = vrot.lane.b32.xlu1 %v878_v33, %s1382_s11 }
0x11fe   :  { %v881_v35 = vpop.permute.xlu1 %880 }
0x11ff   :  { %v883_v36 = vadd.f32 %v881_v35, %v873_v34 }
0x1201   :  { %1370 = vtanh.f32 %v883_v36 }
0x120e   :  { %v1371_v37 = vpop.eup %1370 }
0x120f   :  { %886 = vrot.lane.b32.xlu0 %v1371_v37, %s1382_s11 }
0x1281   :  { %v887_v38 = vpop.permute.xlu0 %886 }
0x1282   :  { %v889_v39 = vmul.f32 %v1369_v31, %v887_v38 }
0x1284   :  { %891 = vrot.lane.b32.xlu1 %v889_v39, %s1383_s3 }
0x12f6   :  { %v892_v40 = vpop.permute.xlu1 %891 }
0x12f7   :  { %1299 = vmatmul.mubr.msk.f32.vlgmr.msra.gmra.mxu0 %vm191_vm3, %v892_v40 }
0x13b7   :  { %v961_v42 = vpop.f32.mrf.mxu0 }
0x13b8   :  { %v965_v43 = vadd.f32 %v961_v42, %v184_v41 }
0x13b9   :  { %v1300_v44 = vpop.f32.mrf.mxu0 }
0x13ba   :  { %1372 = vtanh.f32 %v965_v43  ;;  %v1106_v46 = vmul.f32 -1.442695, %v965_v43 }
0x13bc   :  { %1374 = vpow2.f32 %v1106_v46 }
0x13c7   :  { %v1373_v45 = vpop.eup %1372 }
0x13c8   :  { %975 = vrot.lane.b32.xlu0 %v1373_v45, %s1382_s11 }
0x13c9   :  { %v1375_v47 = vpop.eup %1374 }
0x13ca   :  { %v969_v48 = vadd.f32 1.0, %v1375_v47 }
0x13cc   :  { %1376 = vrcp.f32 %v969_v48 }
0x13d9   :  { %v1377_v49 = vpop.eup %1376 }
0x13da   :  { %v973_v52 = vmul.f32 %v1377_v49, %v883_v36 }
0x143a   :  { %v976_v50 = vpop.permute.xlu0 %975 }
0x143b   :  { %v978_v51 = vmul.f32 %v1377_v49, %v976_v50 }
0x143d   :  { %980 = vrot.lane.b32.xlu1 %v978_v51, %s1382_s11 }
0x14af   :  { %v981_v53 = vpop.permute.xlu1 %980 }
0x14b0   :  { %v983_v23 = vadd.f32 %v981_v53, %v973_v52 }
0x14b2   :  { %1378 = vtanh.f32 %v983_v23 }
0x14bf   :  { %v1379_v58 = vpop.eup %1378 }
0x14c0   :  { %986 = vrot.lane.b32.xlu0 %v1379_v58, %s1382_s11 }
0x1532   :  { %v987_v60 = vpop.permute.xlu0 %986 }
0x1533   :  { %v989_v61 = vmul.f32 %v1377_v49, %v987_v60 }
0x1535   :  { %1002 = vrot.lane.b32.xlu1 %v989_v61, %s1383_s3 }
0x15a7   :  { %v1003_v62 = vpop.permute.xlu1 %1002 }
0x15a8   :  { %1310 = vmatmul.mubr.msk.f32.vlgmr.msra.gmra.mxu1 %vm191_vm3, %v1003_v62 }
0x1668   :  { %v1072_v0 = vpop.f32.mrf.mxu1 }
0x1669   :  { %v1073_v2 = vadd.f32 %v1107_v63, %v1072_v0 }
0x166a   :  { %v1311_v1 = vpop.f32.mrf.mxu1 }
0x166b   :  { %1077 = vst.msk [vmem:[%s1674_s6] sm:$0xff] %vm1076_vm4, %v1073_v2 }

</bundles_post_ra>
